<compile_context>
chip_gen: v5e
topology: v5e:2x2
jax: 0.10.0
libtpu: 0.0.40
codegen_flags: <defaults>
</compile_context>

<pallas_src>
import functools
import math

import jax
import jax.numpy as jnp
from jax.experimental import pallas as pl
from jax.experimental.pallas import tpu as pltpu

_NEG_LOG_1E4 = -math.log(1e-4)   # -ln(1e-4), folded RCE constant


def _sce_kernel(pred_ref, labels_ref, out_ref, *,
                alpha, beta, n_rows, tile_n, tiles_per_split, inv_n):
    i = pl.program_id(0)          # core split (parallel)
    j = pl.program_id(1)          # row tile within split (arbitrary, pipelined)

    @pl.when(j == 0)
    def _init():
        out_ref[...] = jnp.zeros_like(out_ref)

    # Logical row-tile index; may point past the data for the last few (i, j)
    # steps (the index_map clamps the DMA; those rows are masked out below).
    block = i * tiles_per_split + j
    row0 = block * tile_n

    pred = pred_ref[...].astype(jnp.float32)             # (tile_n, C)
    labels = labels_ref[...]                              # (tile_n, 1) int32
    tn, c = pred.shape

    # Row mask for the ragged tail / clamped duplicate blocks.  Sanitize
    # BEFORE max/exp: out-of-bounds rows may hold arbitrary (Inf/NaN) data.
    rows = jax.lax.broadcasted_iota(jnp.int32, (tn, 1), 0) + row0
    row_valid = rows < n_rows                             # (tile_n, 1) bool
    pred = jnp.where(row_valid, pred, 0.0)

    # one-hot via a (1, C) iota broadcast (no full (tile_n, C) iota tile)
    class_ids = jax.lax.broadcasted_iota(jnp.int32, (1, c), 1)
    onehot = class_ids == labels                          # (tile_n, C) bool

    # Stable softmax pieces.
    m = jnp.max(pred, axis=1, keepdims=True)              # (tile_n, 1)
    z = pred - m
    expz = jnp.exp(z)
    sumexp = jnp.sum(expz, axis=1, keepdims=True)
    inv_sumexp = pl.reciprocal(sumexp, approx=False)      # exact: 1e-5 tol

    # cross entropy:  ce_per = log(sum_j exp(z_j)) - z_y
    z_y = jnp.sum(jnp.where(onehot, z, 0.0), axis=1, keepdims=True)

    # reverse CE:  rce_per = -ln(1e-4) * (sum_j clip(p_j) - clip(p_y))
    # p_y is derived from z_y (bit-identical to selecting it from p), saving a
    # second full-tile select + lane reduction.  p <= 1 so maximum() == clip().
    p_clip = jnp.maximum(expz * inv_sumexp, 1e-7)
    sum_p_clip = jnp.sum(p_clip, axis=1, keepdims=True)
    p_y_clip = jnp.maximum(jnp.exp(z_y) * inv_sumexp, 1e-7)

    per_row = (alpha * (jnp.log(sumexp) - z_y)
               + (beta * _NEG_LOG_1E4) * (sum_p_clip - p_y_clip))
    partial = jnp.sum(jnp.where(row_valid, per_row, 0.0)) * inv_n
    out_ref[...] = out_ref[...] + partial                 # scalar bcast accum


def _round_up(x, m):
    return (x + m - 1) // m * m


def _vmem_limit_bytes():
    # Per-generation VMEM budget: v5e/v6e have 128 MiB per TC, v7x only 64 MiB.
    cap = None
    try:
        cap = getattr(pltpu.get_tpu_info(), "vmem_capacity_bytes", None)
    except Exception:
        cap = None
    if not cap:
        cap = 64 * 1024 * 1024                   # conservative (v7x) fallback
    return int(min(cap * 3 // 4, 96 * 1024 * 1024))


def sce_loss(pred, labels, *, alpha, beta, num_classes,
             tile_n=None, num_core_splits=2):
    """pred: (N, C) float array, labels: (N,) int array -> scalar f32 loss."""
    n, c = pred.shape
    assert c == num_classes, (c, num_classes)

    vmem_limit = _vmem_limit_bytes()
    itemsize = jnp.dtype(pred.dtype).itemsize
    c_lanes = _round_up(c, 128)                  # VMEM lane footprint of a row

    if tile_n is None:
        # Target ~1-4 MiB per pred tile; keep double-buffering well inside the
        # per-generation scoped-VMEM limit.
        tile_budget = min(4 * 1024 * 1024, vmem_limit // 8)
        tile_n = tile_budget // (c_lanes * itemsize)
        tile_n = max(8, min((tile_n // 8) * 8, 4096))
    tile_n = min(_round_up(tile_n, 8), _round_up(n, 8))
    # TODO(synk): for very large class counts (a single (8, C) tile exceeding
    # the VMEM budget) add a class-axis grid dimension with an online-softmax
    # running (max, sumexp) instead of one block spanning all classes.

    total_tiles = -(-n // tile_n)
    num_core_splits = max(1, min(num_core_splits, total_tiles))
    tiles_per_split = -(-total_tiles // num_core_splits)
    last_block = total_tiles - 1

    labels2d = labels.astype(jnp.int32).reshape(n, 1)

    def row_map(i, j):
        # Clamp so the DMA never indexes past the array; logically out-of-range
        # tiles are fully masked inside the kernel via row_valid.
        return (jnp.minimum(i * tiles_per_split + j, last_block), 0)

    kernel = functools.partial(
        _sce_kernel, alpha=float(alpha), beta=float(beta), n_rows=n,
        tile_n=tile_n, tiles_per_split=tiles_per_split, inv_n=1.0 / n)

    grid_spec = pltpu.PrefetchScalarGridSpec(
        num_scalar_prefetch=0,
        grid=(num_core_splits, tiles_per_split),
        in_specs=[
            pl.BlockSpec((tile_n, c), row_map),   # last dim == full C: no pad
            pl.BlockSpec((tile_n, 1), row_map),
        ],
        out_specs=pl.BlockSpec((8, 128), lambda i, j: (i, 0)),
    )
    out = pl.pallas_call(
        kernel,
        out_shape=jax.ShapeDtypeStruct((num_core_splits * 8, 128), jnp.float32),
        grid_spec=grid_spec,
        compiler_params=pltpu.CompilerParams(
            dimension_semantics=("parallel", "arbitrary"),
            vmem_limit_bytes=vmem_limit),
    )(pred, labels2d)
    # Every element of split i's (8, 128) block holds that split's partial sum.
    return jnp.sum(out[::8, 0])


def _sce_loss_ref(pred, labels, *, alpha, beta, num_classes):
    # pure-JAX reference (mirrors the PyTorch module) for sanity check
    logp = jax.nn.log_softmax(pred, axis=1)
    oh = jax.nn.one_hot(labels, num_classes, dtype=jnp.float32)
    ce = jnp.mean(-jnp.sum(oh * logp, axis=1))
    p = jnp.clip(jax.nn.softmax(pred, axis=1), 1e-7, 1.0)
    ohc = jnp.clip(oh, 1e-4, 1.0)
    rce = jnp.mean(-jnp.sum(p * jnp.log(ohc), axis=1))
    return alpha * ce + beta * rce


if __name__ == "__main__":
    key = jax.random.PRNGKey(0)
    k1, k2 = jax.random.split(key)

    batch = 8
    num_classes = 10
    alpha, beta = 0.1, 1.0

    pred = jax.random.normal(k1, (batch, num_classes), dtype=jnp.float32)
    labels = jax.random.randint(k2, (batch,), 0, num_classes, dtype=jnp.int32)

    loss = sce_loss(pred, labels, alpha=alpha, beta=beta, num_classes=num_classes)
    loss = jax.block_until_ready(loss)

    ref = _sce_loss_ref(pred, labels, alpha=alpha, beta=beta, num_classes=num_classes)
    assert jnp.allclose(loss, ref, rtol=1e-5, atol=1e-5), (loss, ref)

    print("KERNEL_OK")
</pallas_src>

<mosaic_0001>
module attributes {stable_mosaic.version = 11 : i64} {
  func.func @_sce_kernel(%arg0: i32, %arg1: i32, %arg2: memref<8x10xf32, #tpu.memory_space<vmem>>, %arg3: memref<8x1xi32, #tpu.memory_space<vmem>>, %arg4: memref<8x128xf32, #tpu.memory_space<vmem>>) attributes {dimension_semantics = [#tpu.dimension_semantics<parallel>, #tpu.dimension_semantics<arbitrary>], iteration_bounds = array<i64: 1, 1>, scalar_prefetch = 0 : i64, scratch_operands = 0 : i64, tpu.core_type = #tpu.core_type<tc>, window_params = [{transform_indices = @transform_0, window_bounds = array<i64: 8, 10>}, {transform_indices = @transform_1, window_bounds = array<i64: 8, 1>}, {transform_indices = @transform_2, window_bounds = array<i64: 8, 128>}]} {
    %c0_i32 = arith.constant 0 : i32
    %0 = arith.cmpi eq, %arg1, %c0_i32 : i32
    %1 = arith.extui %0 : i1 to i32
    %c0_i32_0 = arith.constant 0 : i32
    %2 = arith.cmpi ne, %1, %c0_i32_0 : i32
    scf.if %2 {
      %cst_21 = arith.constant 0.000000e+00 : f32
      %62 = vector.broadcast %cst_21 : f32 to vector<8x128xf32>
      %c0_22 = arith.constant 0 : index
      %c0_23 = arith.constant 0 : index
      %63 = vector.load %arg4[%c0_22, %c0_23] : memref<8x128xf32, #tpu.memory_space<vmem>>, vector<8x128xf32>
      tpu.vector_store %arg4[%c0_22, %c0_23], %62 {strides = array<i32>} : memref<8x128xf32, #tpu.memory_space<vmem>>, vector<8x128xf32>,
    } else {
    }
    %c1_i32 = arith.constant 1 : i32
    %3 = arith.muli %arg0, %c1_i32 : i32
    %4 = arith.addi %3, %arg1 : i32
    %c8_i32 = arith.constant 8 : i32
    %5 = arith.muli %4, %c8_i32 : i32
    %c0 = arith.constant 0 : index
    %c0_1 = arith.constant 0 : index
    %6 = vector.load %arg2[%c0, %c0_1] : memref<8x10xf32, #tpu.memory_space<vmem>>, vector<8x10xf32>
    %c0_2 = arith.constant 0 : index
    %c0_3 = arith.constant 0 : index
    %7 = vector.load %arg3[%c0_2, %c0_3] : memref<8x1xi32, #tpu.memory_space<vmem>>, vector<8x1xi32>
    %8 = tpu.iota {dimensions = array<i32: 0>} : vector<8x1xi32>
    %9 = vector.broadcast %5 : i32 to vector<8x1xi32>
    %10 = arith.addi %8, %9 : vector<8x1xi32>
    %c8_i32_4 = arith.constant 8 : i32
    %11 = vector.broadcast %c8_i32_4 : i32 to vector<8x1xi32>
    %12 = arith.cmpi slt, %10, %11 : vector<8x1xi32>
    %cst = arith.constant 0.000000e+00 : f32
    %13 = vector.shape_cast %12 : vector<8x1xi1> to vector<8x1xi1>
    %14 = vector.broadcast %13 : vector<8x1xi1> to vector<8x10xi1>
    %15 = vector.broadcast %cst : f32 to vector<8x10xf32>
    %16 = arith.select %14, %6, %15 : vector<8x10xi1>, vector<8x10xf32>
    %17 = tpu.iota {dimensions = array<i32: 1>} : vector<1x10xi32>
    %18 = vector.broadcast %17 : vector<1x10xi32> to vector<8x10xi32>
    %19 = vector.broadcast %7 : vector<8x1xi32> to vector<8x10xi32>
    %20 = arith.cmpi eq, %18, %19 : vector<8x10xi32>
    %cst_5 = arith.constant dense<0xFF800000> : vector<8xf32>
    %21 = vector.multi_reduction <maximumf>, %16, %cst_5 [1] : vector<8x10xf32> to vector<8xf32>
    %22 = vector.shape_cast %21 : vector<8xf32> to vector<8x1xf32>
    %23 = vector.broadcast %22 : vector<8x1xf32> to vector<8x10xf32>
    %24 = arith.subf %16, %23 : vector<8x10xf32>
    %25 = math.exp %24 : vector<8x10xf32>
    %cst_6 = arith.constant dense<0.000000e+00> : vector<8xf32>
    %26 = vector.multi_reduction <add>, %25, %cst_6 [1] : vector<8x10xf32> to vector<8xf32>
    %27 = vector.shape_cast %26 : vector<8xf32> to vector<8x1xf32>
    %28 = tpu.reciprocal %27 : vector<8x1xf32> -> vector<8x1xf32>
    %cst_7 = arith.constant 0.000000e+00 : f32
    %29 = vector.broadcast %cst_7 : f32 to vector<8x10xf32>
    %30 = arith.select %20, %24, %29 : vector<8x10xi1>, vector<8x10xf32>
    %cst_8 = arith.constant dense<0.000000e+00> : vector<8xf32>
    %31 = vector.multi_reduction <add>, %30, %cst_8 [1] : vector<8x10xf32> to vector<8xf32>
    %32 = vector.shape_cast %31 : vector<8xf32> to vector<8x1xf32>
    %33 = vector.broadcast %28 : vector<8x1xf32> to vector<8x10xf32>
    %34 = arith.mulf %25, %33 : vector<8x10xf32>
    %cst_9 = arith.constant 1.000000e-07 : f32
    %35 = vector.broadcast %cst_9 : f32 to vector<8x10xf32>
    %36 = arith.maximumf %34, %35 : vector<8x10xf32>
    %cst_10 = arith.constant dense<0.000000e+00> : vector<8xf32>
    %37 = vector.multi_reduction <add>, %36, %cst_10 [1] : vector<8x10xf32> to vector<8xf32>
    %38 = vector.shape_cast %37 : vector<8xf32> to vector<8x1xf32>
    %39 = math.exp %32 : vector<8x1xf32>
    %40 = arith.mulf %39, %28 : vector<8x1xf32>
    %cst_11 = arith.constant 1.000000e-07 : f32
    %41 = vector.broadcast %cst_11 : f32 to vector<8x1xf32>
    %42 = arith.maximumf %40, %41 : vector<8x1xf32>
    %43 = math.log %27 : vector<8x1xf32>
    %44 = arith.subf %43, %32 : vector<8x1xf32>
    %cst_12 = arith.constant 1.000000e-01 : f32
    %45 = vector.broadcast %cst_12 : f32 to vector<8x1xf32>
    %46 = arith.mulf %45, %44 : vector<8x1xf32>
    %47 = arith.subf %38, %42 : vector<8x1xf32>
    %cst_13 = arith.constant 9.21034049 : f32
    %48 = vector.broadcast %cst_13 : f32 to vector<8x1xf32>
    %49 = arith.mulf %48, %47 : vector<8x1xf32>
    %50 = arith.addf %46, %49 : vector<8x1xf32>
    %cst_14 = arith.constant 0.000000e+00 : f32
    %51 = vector.broadcast %cst_14 : f32 to vector<8x1xf32>
    %52 = arith.select %12, %50, %51 : vector<8x1xi1>, vector<8x1xf32>
    %53 = vector.shape_cast %52 : vector<8x1xf32> to vector<1x8x1xf32>
    %cst_15 = arith.constant dense<0.000000e+00> : vector<1xf32>
    %54 = vector.multi_reduction <add>, %53, %cst_15 [1, 2] : vector<1x8x1xf32> to vector<1xf32>
    %55 = vector.shape_cast %54 : vector<1xf32> to vector<1x1x1xf32>
    %56 = vector.extract %55[0, 0, 0] : f32 from vector<1x1x1xf32>
    %cst_16 = arith.constant 1.250000e-01 : f32
    %57 = arith.mulf %56, %cst_16 : f32
    %c0_17 = arith.constant 0 : index
    %c0_18 = arith.constant 0 : index
    %58 = vector.load %arg4[%c0_17, %c0_18] : memref<8x128xf32, #tpu.memory_space<vmem>>, vector<8x128xf32>
    %59 = vector.broadcast %57 : f32 to vector<8x128xf32>
    %60 = arith.addf %58, %59 : vector<8x128xf32>
    %c0_19 = arith.constant 0 : index
    %c0_20 = arith.constant 0 : index
    %61 = vector.load %arg4[%c0_19, %c0_20] : memref<8x128xf32, #tpu.memory_space<vmem>>, vector<8x128xf32>
    tpu.vector_store %arg4[%c0_19, %c0_20], %60 {strides = array<i32>} : memref<8x128xf32, #tpu.memory_space<vmem>>, vector<8x128xf32>,
    return
  }
  func.func @transform_0(%arg0: i32, %arg1: i32) -> (i32, i32) {
    %c1_i32 = arith.constant 1 : i32
    %0 = arith.muli %arg0, %c1_i32 : i32
    %1 = arith.addi %0, %arg1 : i32
    %c0_i32 = arith.constant 0 : i32
    %2 = arith.minsi %1, %c0_i32 : i32
    %c0_i32_0 = arith.constant 0 : i32
    %c0_i32_1 = arith.constant 0 : i32
    return %2, %c0_i32_0 : i32, i32
  }
  func.func @transform_1(%arg0: i32, %arg1: i32) -> (i32, i32) {
    %c1_i32 = arith.constant 1 : i32
    %0 = arith.muli %arg0, %c1_i32 : i32
    %1 = arith.addi %0, %arg1 : i32
    %c0_i32 = arith.constant 0 : i32
    %2 = arith.minsi %1, %c0_i32 : i32
    %c0_i32_0 = arith.constant 0 : i32
    %c0_i32_1 = arith.constant 0 : i32
    return %2, %c0_i32_0 : i32, i32
  }
  func.func @transform_2(%arg0: i32, %arg1: i32) -> (i32, i32) {
    %c0_i32 = arith.constant 0 : i32
    %c0_i32_0 = arith.constant 0 : i32
    return %arg0, %c0_i32 : i32, i32
  }
}

</mosaic_0001>

<bundles_post_ra>
// kernel: tpu_custom_call.1
= control target key start
LH: loop header
LB: loop body
LE: loop exit
PB: predicated region body
PF: predicated region fallthrough
CT: control target
= control target key end

     0   :  { %vm89_vm0 = vcmask 80896   ;;  %s249_s0 = inlined_call_operand.vmem [shape: f32[8,10], index: 0, kind: input, shape index: {}]   ;;  %s250_s1 = inlined_call_operand.vmem [shape: s32[8,1], index: 1, kind: input, shape index: {}]   ;;  %s251_s2 = inlined_call_operand.hbm [shape: f32[8,128], index: 2, kind: output, shape index: {}]  }
   0x1   :  { %v73_v0 = vld [vmem:[%s249_s0] sm:$0xff] }
   0x2   :  { %v74_v1 = vld [vmem:[%s250_s1] sm:$0xff] }
   0x3   :  { %7 = vsyncpa [#allocation3], 0  ;;  %v90_v2 = vsel %vm89_vm0, %v73_v0, -inf  ;;  %v219_v3 = vmov 0   ;;  %v83_v4 = vlaneseq  ;;  %vm134_vm6 = vcmask 7168   ;;  %s220_s1 = smov [#allocation2]  }
   0x4   :  { %183 = vset.pattern.permute.xlu1 %v219_v3  ;;  %184 = vset.pattern.permute.xlu0 %v219_v3  ;;  %s155_s13 = sshll.u32 %s220_s1, 4  ;;  %s157_s17 = sshll.u32 %s251_s2, 4  ;;  %s156_s13 = int_to_ptr.vmem [resolvable:$true] %s155_s13  ;;  %s158_s17 = int_to_ptr.hbm [resolvable:$true] %s157_s17 }
   0x5   :  { %91 = vmax.xlane.f32.xlu0 %v90_v2  ;;  %86 = vperm.xlu1 %183, %v74_v1   ;;  %v84_v5 = vand.u32 127, %v83_v4 }
  0x77   :  { %v87_v6 = vpop.permute.xlu1 %86 }
  0x78   :  { %v92_v7 = vpop.xlane.xlu0 %91  ;;  %vm88_vm1 = vcmp.eq.s32.totalorder %v84_v5, %v87_v6 }
  0x79   :  { %v93_v8 = vsub.f32 %v73_v0, %v92_v7 }
  0x7b   :  { %v94_v9 = vmul.f32 1.442695, %v93_v8  ;;  %v113_v10 = vsel %vm88_vm1, %v93_v8, 0.0 }
  0x7c   :  { %v114_v11 = vsel %vm89_vm0, %v113_v10, 0.0 }
  0x7d   :  { %185 = vpow2.f32 %v94_v9  ;;  %115 = vadd.xlane.f32.xlu1 %v114_v11 }
  0x83   :  { %v186_v12 = vpop.eup %185 }
  0x84   :  { %v96_v13 = vsel %vm89_vm0, %v186_v12, 0.0 }
  0x85   :  { %97 = vadd.xlane.f32.xlu0 %v96_v13 }
  0xf0   :  { %v116_v28 = vpop.xlane.xlu1 %115 }
  0xf1   :  { %v122_v29 = vmul.f32 1.442695, %v116_v28 }
  0xf8   :  { %v98_v14 = vpop.xlane.xlu0 %97 }
  0xf9   :  { %187 = vrcp.f32 %v98_v14  ;;  %v110_v18 = vand.u32 2147483648, %v98_v14  ;;  %v108_v20 = vand.u32 2147483647, %v98_v14  ;;  %vm104_vm3 = vweird.f32 %v98_v14 }
  0xfa   :  { %189 = vlog2.f32 %v98_v14 }
  0xfb   :  { %v111_v22 = vor.u32 1.1754944e-38, %v110_v18  ;;  %vm109_vm5 = vcmp.eq.f32.partialorder %v108_v20, 8.507059e+37  ;;  %191 = vpow2.f32 %v122_v29 }
  0xff   :  { %v188_v15 = vpop.eup %187 }
 0x100   :  { %v100_v16 = vmul.f32 %v188_v15, %v98_v14  ;;  %vm105_vm2 = vweird.f32 %v188_v15  ;;  %v190_v30 = vpop.eup %189 }
 0x101   :  { %vm106_vm4 = vmor %vm104_vm3, %vm105_vm2  ;;  %v192_v31 = vpop.eup %191  ;;  %v127_v33 = vmul.f32 0.6931472, %v190_v30 }
 0x102   :  { %v101_v17 = vsub.f32 1.0, %v100_v16 }
 0x103   :  { %v128_v35 = vsub.f32 %v127_v33, %v116_v28 }
 0x104   :  { %v102_v19 = vmul.f32 %v188_v15, %v101_v17 }
 0x105   :  { %v129_v39 = vmul.f32 0.1, %v128_v35 }
 0x106   :  { %v103_v21 = vadd.f32 %v188_v15, %v102_v19 }
 0x108   :  { %v107_v23 = vsel %vm106_vm4, %v188_v15, %v103_v21 }
 0x109   :  { %v112_v24 = vsel %vm109_vm5, %v111_v22, %v107_v23 }
 0x10a   :  { %v117_v25 = vmul.f32 %v186_v12, %v112_v24  ;;  %v124_v32 = vmul.f32 %v192_v31, %v112_v24 }
 0x10c   :  { %v118_v26 = vmax.f32 %v117_v25, 1e-07  ;;  %v125_v34 = vmax.f32 %v124_v32, 1e-07 }
 0x10e   :  { %v119_v27 = vsel %vm89_vm0, %v118_v26, 0.0 }
 0x10f   :  { %120 = vadd.xlane.f32.xlu2 %v119_v27 }
 0x182   :  { %v121_v36 = vpop.xlane.xlu2 %120 }
 0x183   :  { %v130_v37 = vsub.f32 %v121_v36, %v125_v34 }
 0x185   :  { %v131_v38 = vmul.f32 9.2103405, %v130_v37 }
 0x187   :  { %v132_v40 = vadd.f32 %v131_v38, %v129_v39 }
 0x189   :  { %v135_v41 = vsel %vm134_vm6, %v132_v40, 0.0 }
 0x18a   :  { %136 = vadd.xlane.f32.xlu2 %v135_v41 }
 0x1fd   :  { %v137_v42 = vpop.xlane.xlu2 %136 }
 0x1fe   :  { %v138_v43 = vrot.slane %v137_v42, 4 }
 0x200   :  { %v139_v44 = vadd.f32 %v138_v43, %v137_v42 }
 0x202   :  { %v140_v45 = vrot.slane %v139_v44, 2 }
 0x204   :  { %v141_v46 = vadd.f32 %v140_v45, %v139_v44 }
 0x206   :  { %v142_v47 = vrot.slane %v141_v46, 1 }
 0x208   :  { %v143_v48 = vadd.f32 %v142_v47, %v141_v46 }
 0x20a   :  { %178 = vpush %v143_v48 }
 0x23b   :  { %s179_s0 = spop %178 }
 0x23c   :  { %s145_s14 = smul.f32 0.125, %s179_s0 }
 0x23e   :  { %v147_v49 = vstv %s145_s14 }
 0x23f   :  { %149 = vst [vmem:[#allocation2] sm:$0xff] %v147_v49 }
 0x240   :  { %160 = dma.vmem_to_hbm [thread:$0]  %s156_s13, 128, %s158_s17, [#allocation3]  }
 0x241   :  { %217 = dma.done.wait [#allocation3], 128  }
 0x242   :  { %218 = vsyncadd [#allocation3], 4294967168 }
 0x243   :  { %165 = vsyncpa [#allocation3], 1 }

</bundles_post_ra>
